<compile_context>
chip_gen: v7x
topology: tpu7x:2x2x1
jax: 0.10.0
libtpu: 0.0.40
codegen_flags: <defaults>
</compile_context>

<pallas_src>
import functools

import jax
import jax.numpy as jnp
from jax.experimental import pallas as pl
from jax.experimental.pallas import tpu as pltpu

EPS = 1e-8
_LANES = 128
_SUBLANES = 8


def _myloss_kernel(x_ref, y_ref, w_ref, acc_ref, *, binary_labels):
    # Zero this core's partial accumulator at the first reduction step.
    @pl.when(pl.program_id(1) == 0)
    def _():
        acc_ref[...] = jnp.zeros_like(acc_ref)

    x = x_ref[...].astype(jnp.float32)
    y = y_ref[...].astype(jnp.float32)
    w = w_ref[...].astype(jnp.float32)

    if binary_labels:
        # One log per element instead of two (exact only for hard 0/1 labels).
        arg = jnp.where(y > 0.5, x, 1.0 - x) + EPS
        entropy = -jnp.log(arg)
    else:
        entropy = (-y * jnp.log(x + EPS)
                   - (1.0 - y) * jnp.log(1.0 - x + EPS))

    contrib = entropy * w
    # Fold the (tm, 128) tile into the (8, 128) accumulator with pure VPU
    # adds; the single cross-lane/sublane reduction happens in the wrapper.
    tm = contrib.shape[0]
    acc_ref[...] += contrib.reshape(tm // _SUBLANES, _SUBLANES, _LANES).sum(axis=0)


def myloss(input_, label, weight, *, binary_labels=False, num_cores=2,
           max_block_rows=2048):
    """Weighted binary cross-entropy sum / 2 (matches Myloss.forward)."""
    assert input_.shape == label.shape == weight.shape
    n = input_.size

    # f32 throughout: v5e's VPU/EUP have no bf16 path; keeps layout (8,128).
    x = jnp.ravel(input_).astype(jnp.float32)
    y = jnp.ravel(label).astype(jnp.float32)
    w = jnp.ravel(weight).astype(jnp.float32)

    # Lane-dense layout: pad flattened length to a multiple of 128.
    rows = pl.cdiv(n, _LANES)

    # Row tile: large enough to amortize per-step overhead, small enough that
    # 3 inputs x 2 buffers x tm x 128 x 4B fits scoped VMEM everywhere
    # (tm=2048 -> 6 MiB total).
    tm = min(max_block_rows, pl.cdiv(rows, num_cores))
    tm = max(_SUBLANES, pl.cdiv(tm, _SUBLANES) * _SUBLANES)

    rows_padded = pl.cdiv(rows, num_cores * tm) * num_cores * tm
    n_padded = rows_padded * _LANES
    pad = n_padded - n
    if pad:
        # input padded strictly inside (0,1), weight padded with 0 -> padded
        # elements contribute exactly zero and no inf/NaN enters the sum.
        x = jnp.concatenate([x, jnp.full((pad,), 0.5, jnp.float32)])
        y = jnp.concatenate([y, jnp.zeros((pad,), jnp.float32)])
        w = jnp.concatenate([w, jnp.zeros((pad,), jnp.float32)])

    x2 = x.reshape(rows_padded, _LANES)
    y2 = y.reshape(rows_padded, _LANES)
    w2 = w.reshape(rows_padded, _LANES)

    tiles_per_core = rows_padded // (num_cores * tm)

    in_spec = pl.BlockSpec((tm, _LANES),
                           lambda p, i: (p * tiles_per_core + i, 0))

    cost = pl.CostEstimate(
        flops=7 * n_padded,
        transcendentals=(n_padded if binary_labels else 2 * n_padded),
        bytes_accessed=3 * 4 * n_padded + num_cores * _SUBLANES * _LANES * 4,
    )

    partials = pl.pallas_call(
        functools.partial(_myloss_kernel, binary_labels=binary_labels),
        out_shape=jax.ShapeDtypeStruct((num_cores, _SUBLANES, _LANES),
                                       jnp.float32),
        grid_spec=pltpu.PrefetchScalarGridSpec(
            num_scalar_prefetch=0,
            grid=(num_cores, tiles_per_core),
            in_specs=[in_spec, in_spec, in_spec],
            out_specs=pl.BlockSpec((None, _SUBLANES, _LANES),
                                   lambda p, i: (p, 0, 0)),
        ),
        compiler_params=pltpu.CompilerParams(
            dimension_semantics=("parallel", "arbitrary")),
        cost_estimate=cost,
    )(x2, y2, w2)

    # Single cross-lane reduction of the per-core partials.
    return jnp.sum(partials) * 0.5


def _myloss_ref(input_, label, weight):
    entropy = (-label * jnp.log(input_ + EPS)
               - (1.0 - label) * jnp.log(1.0 - input_ + EPS))
    return jnp.sum(entropy * weight) / 2.0


if __name__ == "__main__":
    key = jax.random.PRNGKey(0)
    k1, k2, k3 = jax.random.split(key, 3)

    # Small NCHW-like shapes consistent with the module's elementwise forward.
    shape = (2, 4, 16, 16)
    # probabilities in (0, 1)
    input_ = jax.nn.sigmoid(jax.random.normal(k1, shape, dtype=jnp.float32))
    # binary labels
    label = jax.random.bernoulli(k2, 0.5, shape).astype(jnp.float32)
    # positive weights
    weight = jax.random.uniform(k3, shape, dtype=jnp.float32, minval=0.1,
                                maxval=2.0)

    ref = _myloss_ref(input_, label, weight)

    # Default path: exact semantics of the original module (soft-label safe).
    loss = myloss(input_, label, weight)
    jax.block_until_ready(loss)
    assert jnp.allclose(loss, ref, rtol=1e-5, atol=1e-5), (loss, ref)

    # Fast path: single log per element, valid here since labels are hard 0/1.
    loss_bin = myloss(input_, label, weight, binary_labels=True)
    jax.block_until_ready(loss_bin)
    assert jnp.allclose(loss_bin, ref, rtol=1e-5, atol=1e-5), (loss_bin, ref)

    print("KERNEL_OK")
</pallas_src>

<mosaic_0001>
module attributes {stable_mosaic.version = 11 : i64} {
  func.func @_myloss_kernel(%arg0: i32, %arg1: i32, %arg2: memref<8x128xf32, #tpu.memory_space<vmem>>, %arg3: memref<8x128xf32, #tpu.memory_space<vmem>>, %arg4: memref<8x128xf32, #tpu.memory_space<vmem>>, %arg5: memref<1x8x128xf32, #tpu.memory_space<vmem>>) attributes {dimension_semantics = [#tpu.dimension_semantics<parallel>, #tpu.dimension_semantics<arbitrary>], iteration_bounds = array<i64: 2, 1>, scalar_prefetch = 0 : i64, scratch_operands = 0 : i64, tpu.core_type = #tpu.core_type<tc>, window_params = [{transform_indices = @transform_0, window_bounds = array<i64: 8, 128>}, {transform_indices = @transform_1, window_bounds = array<i64: 8, 128>}, {transform_indices = @transform_2, window_bounds = array<i64: 8, 128>}, {transform_indices = @transform_3, window_bounds = array<i64: 1, 8, 128>}]} {
    %c0_i32 = arith.constant 0 : i32
    %0 = arith.cmpi eq, %arg1, %c0_i32 : i32
    %1 = arith.extui %0 : i1 to i32
    %c0_i32_0 = arith.constant 0 : i32
    %2 = arith.cmpi ne, %1, %c0_i32_0 : i32
    scf.if %2 {
      %cst_17 = arith.constant 0.000000e+00 : f32
      %30 = vector.broadcast %cst_17 : f32 to vector<8x128xf32>
      %c0_18 = arith.constant 0 : index
      %c0_19 = arith.constant 0 : index
      %c0_20 = arith.constant 0 : index
      %31 = vector.load %arg5[%c0_18, %c0_19, %c0_20] : memref<1x8x128xf32, #tpu.memory_space<vmem>>, vector<1x8x128xf32>
      %32 = vector.shape_cast %31 : vector<1x8x128xf32> to vector<8x128xf32>
      %33 = vector.shape_cast %30 : vector<8x128xf32> to vector<1x8x128xf32>
      tpu.vector_store %arg5[%c0_18, %c0_19, %c0_20], %33 {strides = array<i32>} : memref<1x8x128xf32, #tpu.memory_space<vmem>>, vector<1x8x128xf32>,
    } else {
    }
    %c0 = arith.constant 0 : index
    %c0_1 = arith.constant 0 : index
    %3 = vector.load %arg2[%c0, %c0_1] : memref<8x128xf32, #tpu.memory_space<vmem>>, vector<8x128xf32>
    %c0_2 = arith.constant 0 : index
    %c0_3 = arith.constant 0 : index
    %4 = vector.load %arg3[%c0_2, %c0_3] : memref<8x128xf32, #tpu.memory_space<vmem>>, vector<8x128xf32>
    %c0_4 = arith.constant 0 : index
    %c0_5 = arith.constant 0 : index
    %5 = vector.load %arg4[%c0_4, %c0_5] : memref<8x128xf32, #tpu.memory_space<vmem>>, vector<8x128xf32>
    %cst = arith.constant 0.000000e+00 : f32
    %6 = vector.broadcast %cst : f32 to vector<8x128xf32>
    %7 = arith.subf %6, %4 : vector<8x128xf32>
    %cst_6 = arith.constant 9.99999993E-9 : f32
    %8 = vector.broadcast %cst_6 : f32 to vector<8x128xf32>
    %9 = arith.addf %3, %8 : vector<8x128xf32>
    %10 = math.log %9 : vector<8x128xf32>
    %11 = arith.mulf %7, %10 : vector<8x128xf32>
    %cst_7 = arith.constant 1.000000e+00 : f32
    %12 = vector.broadcast %cst_7 : f32 to vector<8x128xf32>
    %13 = arith.subf %12, %4 : vector<8x128xf32>
    %cst_8 = arith.constant 1.000000e+00 : f32
    %14 = vector.broadcast %cst_8 : f32 to vector<8x128xf32>
    %15 = arith.subf %14, %3 : vector<8x128xf32>
    %cst_9 = arith.constant 9.99999993E-9 : f32
    %16 = vector.broadcast %cst_9 : f32 to vector<8x128xf32>
    %17 = arith.addf %15, %16 : vector<8x128xf32>
    %18 = math.log %17 : vector<8x128xf32>
    %19 = arith.mulf %13, %18 : vector<8x128xf32>
    %20 = arith.subf %11, %19 : vector<8x128xf32>
    %21 = arith.mulf %20, %5 : vector<8x128xf32>
    %c0_10 = arith.constant 0 : index
    %c0_11 = arith.constant 0 : index
    %c0_12 = arith.constant 0 : index
    %22 = vector.load %arg5[%c0_10, %c0_11, %c0_12] : memref<1x8x128xf32, #tpu.memory_space<vmem>>, vector<1x8x128xf32>
    %23 = vector.shape_cast %22 : vector<1x8x128xf32> to vector<8x128xf32>
    %24 = vector.shape_cast %21 : vector<8x128xf32> to vector<1x8x128xf32>
    %cst_13 = arith.constant dense<0.000000e+00> : vector<8x128xf32>
    %25 = vector.multi_reduction <add>, %24, %cst_13 [0] : vector<1x8x128xf32> to vector<8x128xf32>
    %26 = arith.addf %23, %25 : vector<8x128xf32>
    %c0_14 = arith.constant 0 : index
    %c0_15 = arith.constant 0 : index
    %c0_16 = arith.constant 0 : index
    %27 = vector.load %arg5[%c0_14, %c0_15, %c0_16] : memref<1x8x128xf32, #tpu.memory_space<vmem>>, vector<1x8x128xf32>
    %28 = vector.shape_cast %27 : vector<1x8x128xf32> to vector<8x128xf32>
    %29 = vector.shape_cast %26 : vector<8x128xf32> to vector<1x8x128xf32>
    tpu.vector_store %arg5[%c0_14, %c0_15, %c0_16], %29 {strides = array<i32>} : memref<1x8x128xf32, #tpu.memory_space<vmem>>, vector<1x8x128xf32>,
    return
  }
  func.func @transform_0(%arg0: i32, %arg1: i32) -> (i32, i32) {
    %c1_i32 = arith.constant 1 : i32
    %0 = arith.muli %arg0, %c1_i32 : i32
    %1 = arith.addi %0, %arg1 : i32
    %c0_i32 = arith.constant 0 : i32
    %c0_i32_0 = arith.constant 0 : i32
    return %1, %c0_i32 : i32, i32
  }
  func.func @transform_1(%arg0: i32, %arg1: i32) -> (i32, i32) {
    %c1_i32 = arith.constant 1 : i32
    %0 = arith.muli %arg0, %c1_i32 : i32
    %1 = arith.addi %0, %arg1 : i32
    %c0_i32 = arith.constant 0 : i32
    %c0_i32_0 = arith.constant 0 : i32
    return %1, %c0_i32 : i32, i32
  }
  func.func @transform_2(%arg0: i32, %arg1: i32) -> (i32, i32) {
    %c1_i32 = arith.constant 1 : i32
    %0 = arith.muli %arg0, %c1_i32 : i32
    %1 = arith.addi %0, %arg1 : i32
    %c0_i32 = arith.constant 0 : i32
    %c0_i32_0 = arith.constant 0 : i32
    return %1, %c0_i32 : i32, i32
  }
  func.func @transform_3(%arg0: i32, %arg1: i32) -> (i32, i32, i32) {
    %c0_i32 = arith.constant 0 : i32
    %c0_i32_0 = arith.constant 0 : i32
    %c0_i32_1 = arith.constant 0 : i32
    return %arg0, %c0_i32, %c0_i32_0 : i32, i32, i32
  }
}

</mosaic_0001>

<bundles_post_ra>
// kernel: tpu_custom_call.1
= control target key start
LH: loop header
LB: loop body
LE: loop exit
PB: predicated region body
PF: predicated region fallthrough
CT: control target
= control target key end

     0   :  { %s1006_s0 = inlined_call_operand.hbm [shape: f32[16,128], index: 0, kind: input, shape index: {}]   ;;  %s1007_s1 = inlined_call_operand.hbm [shape: f32[16,128], index: 1, kind: input, shape index: {}]   ;;  %s1008_s2 = inlined_call_operand.hbm [shape: f32[16,128], index: 2, kind: input, shape index: {}]   ;;  %s1009_s3 = inlined_call_operand.hbm [shape: f32[2,8,128], index: 3, kind: output, shape index: {}]  }
   0x1   :  { %1015 = sst [smem:[#allocation15_spill]] %s1007_s1 }
   0x2   :  { %8 = vsyncpa [#allocation3], 0 }
   0x3   :  { %10 = vsyncpa [#allocation3 + $0x1], 0 }
   0x4   :  { %11 = vsyncpa [#allocation6], 0 }
   0x5   :  { %13 = vsyncpa [#allocation6 + $0x1], 0 }
   0x6   :  { %14 = vsyncpa [#allocation4], 0 }
   0x7   :  { %16 = vsyncpa [#allocation4 + $0x1], 0  ;;  %s742_s12 = smov 0   ;;  %s744_s13 = smov 0  }
   0x8   :  { %s746_s14 = smov 0   ;;  %s748_s15 = smov 0  }
   0x9   :  { %s750_s16 = smov 0   ;;  %s752_s17 = smov 0  }
   0xa LB: > { %1016 = sst [smem:[#allocation12_spill]] %s712_s16  ;;  %s773_s18 = sadd.s32 4294967295, %s716_s17   ;;  %s716_s17 = sphi %s752_s17, %s22_s17   ;;  %s712_s16 = sphi %s750_s16, %s1037_s16   ;;  %s708_s15 = sphi %s748_s15, %s1036_s15   ;;  %s704_s14 = sphi %s746_s14, %s1040_s14   ;;  %s700_s13 = sphi %s744_s13, %s1039_s13   ;;  %s696_s12 = sphi %s742_s12, %s1038_s12  }
   0xb   : > { %s445_s19 = sadd.s32 4294967294, %s716_s17   ;;  %s34_s20 = sadd.s32 1, %s712_s16 }
   0xc   : > { %s43_s21 = sadd.s32 1, %s704_s14  ;;  %p36_p0 = scmp.ge.s32.totalorder %s34_s20, 2 }
   0xd   : > { %p50_p1 = scmp.ne.s32.totalorder %s704_s14, %s700_s13  ;;  %p51_p2 = scmp.eq.s32.totalorder %s716_s17, 0 }
   0xe   : > { %p56_p3 = scmp.ne.s32.totalorder %s700_s13, %s696_s12  ;;  %s1042_s20 = smov (%p36_p0, %s34_s20), 0 }
   0xf   : > { %1017 = sst [smem:[#allocation13_spill]] %s1042_s20  ;;  %p785_p4 = por %p51_p2, %p50_p1 }
  0x10   : > { %p57_p5 = scmp.eq.s32.totalorder %s773_s18, 0  ;;  %s40_s23 = ssub.s32 %s712_s16, %s1042_s20 }
  0x11   : > { %p136_p6 = scmp.eq.s32.totalorder %s773_s18, 1  ;;  %p41_p7 = scmp.eq.s32.totalorder %s40_s23, 0 }
  0x12   : > { %p793_p8 = por %p57_p5, %p56_p3  ;;  %p142_p10 = scmp.eq.s32.totalorder %s445_s19, 1 }
  0x13   : > { %p797_p9 = por %p136_p6, %p50_p1  ;;  %p485_p13 = scmp.lt.s32.totalorder %s716_s17, 2 }
  0x14   : > { %s1019_s24 = scalar_select %p793_p8, 1, 0 }
  0x15   : > { %s1020_s25 = scalar_select %p797_p9, 1, 0 }
  0x16   : > { %s802_s26 = scalar_select %p41_p7, %s704_s14, %s43_s21  }
  0x17   : > { %p804_p11 = por %p142_p10, %p56_p3  ;;  %s162_s28 = sand.u32 1, %s704_s14  }
  0x18   : > { %1021 = sst [smem:[#allocation14_spill]] %s802_s26  ;;  %s813_s29 = sshll.u32 %s162_s28, 3 }
  0x19   : > { %s1022_s27 = scalar_select %p804_p11, 1, 0 }
  0x1a   : > { %s816_s30 = sshll.u32 %s712_s16, 7  ;;  %p820_p0 = pnand %p485_p13, %p785_p4 }
  0x1b   : > { %s181_s5 = sand.u32 1, %s716_s17   ;;  %s1024_s1 = sld [smem:[#allocation15_spill]] }
  0x1c   : > { %s1023_s4 = scalar_select %p820_p0, 1, 0 }
  0x1d   : > { %s185_s9 = scalar_lea.vmem [#allocation5], %s813_s29  ;;  %s836_s11 = scalar_lea.sflag [#allocation6], %s181_s5 }
  0x1e   : > { %s193_s10 = sshll.u32 %s185_s9, 4  ;;  %p842_p4 = pneg %p820_p0  ;;  %s833_s10 = int_to_ptr.vmem [resolvable:$true] %s193_s10 }
  0x21   : > { %s829_s8 = scalar_lea.hbm %s1024_s1, %s816_s30  ;;  %s545_s6 = scalar_lea.hbm %s1024_s1, 256 }
  0x22   : > { %s540_s19 = scalar_lea.hbm %s829_s8, 128  ;;  %p546_p7 = scmp.lt.u32.totalorder %s829_s8, %s1024_s1 }
  0x23   : > { %p541_p3 = scmp.ne.s32.totalorder %s829_s8, %s540_s19  ;;  %p547_p10 = scmp.lt.u32.totalorder %s545_s6, %s540_s19 }
  0x24   : > { %p549_p12 = scmp.lt.u32.totalorder %s540_s19, %s829_s8 }
  0x25   : > { %p543_p5 = pnand %p842_p4, %p541_p3  ;;  %p548_p13 = por %p547_p10, %p546_p7 }
  0x27   : > { %p544_p6 = pneg %p543_p5  ;;  %p550_p1 = por %p549_p12, %p548_p13 }
  0x29   : > { %p551_p2 = pnand %p550_p1, %p544_p6 }
  0x2b   : > { %554 = shalt.err (!%p551_p2)
}
  0x2c   : > { %s555_s5 = scalar_lea.vmem %s833_s10, 128  ;;  %s718_s22 = smov [#allocation5]  }
  0x2d   : > { %p556_p3 = scmp.ne.s32.totalorder %s833_s10, %s555_s5  ;;  %s560_s23 = sshll.u32 %s718_s22, 4  ;;  %s561_s23 = int_to_ptr.vmem [resolvable:$false] %s560_s23 }
  0x2e   : > { %s562_s7 = scalar_lea.vmem %s561_s23, 256  ;;  %p563_p9 = scmp.lt.s32.totalorder %s833_s10, %s561_s23 }
  0x2f   : > { %p558_p5 = pnand %p556_p3, %p842_p4  ;;  %p564_p8 = scmp.lt.s32.totalorder %s562_s7, %s555_s5 }
  0x31   : > { %p559_p11 = pneg %p558_p5  ;;  %p565_p7 = por %p564_p8, %p563_p9 }
  0x33   : > { %p566_p10 = pnand %p565_p7, %p559_p11 }
  0x35   : > { %569 = shalt.err (!%p566_p10)
}
  0x36   : > { %477 = dma.hbm_to_vmem [thread:$0]  (!%p820_p0), %s829_s8, 128, %s833_s10, %s836_s11  }
  0x37   : > { %p1026_p12 = scmp.lt.s32.totalorder %s716_s17, 3  ;;  %p1027_p1 = scmp.ge.s32.totalorder %s716_s17, 1 }
  0x38   : > { %s878_s5 = scalar_lea.hbm %s1006_s0, %s816_s30  ;;  %s166_s22 = scalar_lea.vmem [#allocation2], %s813_s29 }
  0x39   : > { %p870_p2 = pnand %p1027_p1, %p1026_p12  ;;  %s174_s23 = sshll.u32 %s166_s22, 4  ;;  %s881_s23 = int_to_ptr.vmem [resolvable:$true] %s174_s23 }
  0x3a   : > { %s887_s7 = scalar_lea.hbm %s1008_s2, %s816_s30  ;;  %s163_s1 = scalar_lea.sflag [#allocation3], %s162_s28 }
  0x3b   : > { %s1028_s19 = scalar_select %p870_p2, 1, 0 }
  0x3c   : > { %s570_s20 = scalar_lea.hbm %s878_s5, 128  ;;  %s575_s16 = scalar_lea.hbm %s1006_s0, 256 }
  0x3d   : > { %p571_p8 = scmp.ne.s32.totalorder %s878_s5, %s570_s20  ;;  %p576_p6 = scmp.lt.u32.totalorder %s878_s5, %s1006_s0 }
  0x3e   : > { %p577_p13 = scmp.lt.u32.totalorder %s575_s16, %s570_s20  ;;  %p579_p5 = scmp.lt.u32.totalorder %s570_s20, %s878_s5 }
  0x3f   : > { %p573_p9 = pnand %p571_p8, %p842_p4 }
  0x40   : > { %p578_p3 = por %p577_p13, %p576_p6 }
  0x41   : > { %p574_p11 = pneg %p573_p9 }
  0x42   : > { %p580_p7 = por %p579_p5, %p578_p3 }
  0x44   : > { %p581_p10 = pnand %p580_p7, %p574_p11 }
  0x46   : > { %584 = shalt.err (!%p581_p10)
}
  0x47   : > { %s585_s28 = scalar_lea.vmem %s881_s23, 128  ;;  %s719_s30 = smov [#allocation2]  }
  0x48   : > { %p586_p12 = scmp.ne.s32.totalorder %s881_s23, %s585_s28  ;;  %s590_s8 = sshll.u32 %s719_s30, 4  ;;  %s591_s8 = int_to_ptr.vmem [resolvable:$false] %s590_s8 }
  0x49   : > { %s592_s26 = scalar_lea.vmem %s591_s8, 256  ;;  %p593_p9 = scmp.lt.s32.totalorder %s881_s23, %s591_s8 }
  0x4a   : > { %p588_p1 = pnand %p586_p12, %p842_p4  ;;  %p594_p2 = scmp.lt.s32.totalorder %s592_s26, %s585_s28 }
  0x4c   : > { %p589_p8 = pneg %p588_p1  ;;  %p595_p6 = por %p594_p2, %p593_p9 }
  0x4e   : > { %p596_p13 = pnand %p595_p6, %p589_p8 }
  0x50   : > { %599 = shalt.err (!%p596_p13)
}
  0x51   : > { %474 = dma.hbm_to_vmem [thread:$0]  (!%p820_p0), %s878_s5, 128, %s881_s23, %s163_s1  }
  0x52   : > { %s204_s16 = scalar_lea.vmem [#allocation7], %s813_s29  ;;  %s600_s10 = scalar_lea.hbm %s887_s7, 128 }
  0x53   : > { %s212_s20 = sshll.u32 %s204_s16, 4  ;;  %p601_p11 = scmp.ne.s32.totalorder %s887_s7, %s600_s10  ;;  %s213_s20 = int_to_ptr.vmem [resolvable:$true] %s212_s20 }
  0x54   : > { %s605_s22 = scalar_lea.hbm %s1008_s2, 256  ;;  %p606_p5 = scmp.lt.u32.totalorder %s887_s7, %s1008_s2 }
  0x55   : > { %p603_p2 = pnand %p601_p11, %p842_p4  ;;  %p607_p7 = scmp.lt.u32.totalorder %s605_s22, %s600_s10 }
  0x56   : > { %p609_p12 = scmp.lt.u32.totalorder %s600_s10, %s887_s7 }
  0x57   : > { %p604_p3 = pneg %p603_p2  ;;  %p608_p10 = por %p607_p7, %p606_p5 }
  0x59   : > { %p610_p1 = por %p609_p12, %p608_p10 }
  0x5b   : > { %p611_p8 = pnand %p610_p1, %p604_p3 }
  0x5d   : > { %614 = shalt.err (!%p611_p8)
}
  0x5e   : > { %s615_s1 = scalar_lea.vmem %s213_s20, 128  ;;  %s720_s29 = smov [#allocation7]  }
  0x5f   : > { %p616_p9 = scmp.ne.s32.totalorder %s213_s20, %s615_s1  ;;  %s620_s5 = sshll.u32 %s720_s29, 4  ;;  %s621_s5 = int_to_ptr.vmem [resolvable:$false] %s620_s5 }
  0x60   : > { %s622_s23 = scalar_lea.vmem %s621_s5, 256  ;;  %p623_p11 = scmp.lt.s32.totalorder %s213_s20, %s621_s5 }
  0x61   : > { %p618_p6 = pnand %p616_p9, %p842_p4  ;;  %p624_p2 = scmp.lt.s32.totalorder %s622_s23, %s615_s1 }
  0x63   : > { %p619_p13 = pneg %p618_p6  ;;  %p625_p0 = por %p624_p2, %p623_p11 }
  0x65   : > { %p626_p5 = pnand %p625_p0, %p619_p13 }
  0x67   : > { %629 = shalt.err (!%p626_p5)
}
  0x68   : > { %p1029_p7 = scmp.ne.s32.totalorder %s1023_s4, 0  ;;  %p1030_p3 = scmp.ne.s32.totalorder %s1028_s19, 0 }
  0x69   : > { %s934_s21 = sand.u32 (!%p1030_p3), 1, %s700_s13   ;;  %p1031_p0 = scmp.ne.s32.totalorder (!%p1030_p3), %s1019_s24, 0 }
  0x6a   : > { %480 = dma.hbm_to_vmem [thread:$0]  (!%p1029_p7), %s887_s7, 128, %s213_s20, %s836_s11  }
  0x6b   : > { %221 = sbr.rel (%p1030_p3) target bundleno = 156 (0x9c), region = 32  ;;  %s937_s8 = sshll.u32 (!%p1030_p3), %s934_s21, 3 }
  0x6c   : > { %s224_s26 = scalar_lea.sflag (!%p1030_p3), [#allocation3], %s934_s21  ;;  %s227_s16 = scalar_lea.vmem (!%p1030_p3), [#allocation2], %s937_s8 }
  0x72   : > { %683 = dma.done.wait (%p1031_p0), %s224_s26, 128  }
  0x73   : > { %685 = vsyncadd (%p1031_p0), %s224_s26, 4294967168  ;;  %s232_s4 = sand.u32 1, %s773_s18   ;;  %s236_s19 = scalar_lea.vmem [#allocation5], %s937_s8 }
  0x74   : > { %s233_s11 = scalar_lea.sflag [#allocation6], %s232_s4 }
  0x75   : > { %687 = dma.done.wait (%p1031_p0), %s233_s11, 256  }
  0x76   : > { %689 = vsyncadd (%p1031_p0), %s233_s11, 4294967040  ;;  %v286_v0 = vld [vmem:[%s227_s16] sm:$0xff]  ;;  %v287_v4 = vld [vmem:[%s236_s19] sm:$0xff]  ;;  %s245_s18 = scalar_lea.vmem [#allocation7], %s937_s8  ;;  %s460_s24 = sshll.u32 %s708_s15, 7 }
  0x77   : > { %v290_v1 = vadd.f32 1e-08, %v286_v0  ;;  %v295_v2 = vsub.f32 1.0, %v286_v0  ;;  %v289_v5 = vsub.f32 0.0, %v287_v4  ;;  %v294_v8 = vsub.f32 1.0, %v287_v4  ;;  %v288_v13 = vld [vmem:[%s245_s18] sm:$0xff]  ;;  %s957_s9 = scalar_lea.hbm %s1009_s3, %s460_s24 }
  0x78   : > { %s277_s7 = scalar_lea.vmem [#allocation8], %s937_s8  ;;  %s307_s22 = scalar_lea.sflag [#allocation4], %s934_s21 }
  0x79   : > { %536 = vlog2.f32 %v290_v1  ;;  %v296_v3 = vadd.f32 1e-08, %v295_v2  ;;  %s320_s20 = sshll.u32 %s277_s7, 4  ;;  %p1032_p10 = scmp.ne.s32.totalorder %s1020_s25, 0  ;;  %s959_s20 = int_to_ptr.vmem [resolvable:$true] %s320_s20 }
  0x7a   : > { %s630_s28 = scalar_lea.vmem %s959_s20, 128  ;;  %s721_s15 = smov [#allocation8]  }
  0x7b   : > { %538 = vlog2.f32 %v296_v3  ;;  %p631_p4 = scmp.ne.s32.totalorder %s959_s20, %s630_s28  ;;  %s634_s30 = sshll.u32 %s721_s15, 4  ;;  %s635_s30 = int_to_ptr.vmem [resolvable:$false] %s634_s30 }
  0x7c   : > { %s636_s1 = scalar_lea.vmem %s635_s30, 256  ;;  %p637_p8 = scmp.lt.s32.totalorder %s959_s20, %s635_s30 }
  0x7d   : > { %p632_p12 = pnand %p631_p4, %p1032_p10  ;;  %p638_p9 = scmp.lt.s32.totalorder %s636_s1, %s630_s28 }
  0x7f   : > { %p633_p1 = pneg %p632_p12  ;;  %p639_p6 = por %p638_p9, %p637_p8 }
  0x81   : > { %p640_p13 = pnand %p639_p6, %p633_p1 }
  0x83   : > { %v537_v6 = vpop.eup %536 }
  0x84   : > { %v292_v7 = vmul.f32 0.6931472, %v537_v6 }
  0x85   : > { %v539_v9 = vpop.eup %538 }
  0x86   : > { %v293_v10 = vmul.f32 %v292_v7, %v289_v5  ;;  %v298_v11 = vmul.f32 0.6931472, %v539_v9 }
  0x88   : > { %v299_v12 = vmul.f32 %v298_v11, %v294_v8 }
  0x8a   : > { %v300_v14 = vsub.f32 %v293_v10, %v299_v12 }
  0x8c   : > { %v301_v15 = vmul.f32 %v300_v14, %v288_v13 }
  0x8e   : > { %305 = vst [vmem:[%s277_s7] sm:$0xff] %v301_v15 }
  0x8f   : > { %643 = shalt.err (!%p640_p13)
}
  0x90   : > { %s644_s29 = scalar_lea.hbm %s957_s9, 128  ;;  %s648_s21 = scalar_lea.hbm %s1009_s3, 256 }
  0x91   : > { %p645_p11 = scmp.ne.s32.totalorder %s957_s9, %s644_s29  ;;  %p649_p7 = scmp.lt.u32.totalorder %s957_s9, %s1009_s3 }
  0x92   : > { %p650_p3 = scmp.lt.u32.totalorder %s648_s21, %s644_s29  ;;  %p652_p4 = scmp.lt.u32.totalorder %s644_s29, %s957_s9 }
  0x93   : > { %p646_p2 = pnand %p645_p11, %p1032_p10 }
  0x94   : > { %p651_p0 = por %p650_p3, %p649_p7 }
  0x95   : > { %p647_p5 = pneg %p646_p2 }
  0x96   : > { %p653_p12 = por %p652_p4, %p651_p0 }
  0x98   : > { %p654_p1 = pnand %p653_p12, %p647_p5 }
  0x9a   : > { %657 = shalt.err (!%p654_p1)
}
  0x9b   : > { %469 = dma.vmem_to_hbm [thread:$0]  (%p1032_p10), %s959_s20, 128, %s957_s9, %s307_s22  }
  0x9c PF: > { %s332_s16 = sand.u32 1, %s696_s12   ;;  %p1033_p8 = scmp.ne.s32.totalorder %s1022_s27, 0 }
  0x9d   : > { %p1034_p9 = scmp.ge.s32.totalorder %s716_s17, 2  ;;  %s333_s4 = scalar_lea.sflag [#allocation4], %s332_s16 }
  0x9f   : > { %p482_p6 = pnand %p1034_p9, %p1033_p8 }
  0xa1   : > { %691 = dma.done.wait (!%p482_p6), %s333_s4, 128  }
  0xa2   : > { %693 = vsyncadd (!%p482_p6), %s333_s4, 4294967168  ;;  %s22_s17 = sadd.s32 1, %s716_s17   ;;  %s1035_s25 = sld [smem:[#allocation14_spill]] }
  0xa3   : > { %p19_p13 = scmp.ge.s32.totalorder %s22_s17, 4   ;;  %s1036_s15 = sld [smem:[#allocation12_spill]] }
  0xa4   : > { %s1037_s16 = sld [smem:[#allocation13_spill]]  ;;  %s1038_s12 = smov %s700_s13 }
  0xa5   : > { %s1039_s13 = smov %s704_s14  ;;  %21 = sbr.rel (!%p19_p13) target bundleno = 10 (0xa), region = 105 }
  0xa8   : > { %s1040_s14 = smov %s1035_s25 }
  0xac   :  { %338 = vsyncpa [#allocation3], 1 }
  0xad   :  { %340 = vsyncpa [#allocation3 + $0x1], 1 }
  0xae   :  { %341 = vsyncpa [#allocation6], 1 }
  0xaf   :  { %343 = vsyncpa [#allocation6 + $0x1], 1 }
  0xb0   :  { %344 = vsyncpa [#allocation4], 1 }
  0xb1   :  { %346 = vsyncpa [#allocation4 + $0x1], 1 }

</bundles_post_ra>
